<compile_context>
chip_gen: v7x
topology: tpu7x:2x2x1
jax: 0.10.0
libtpu: 0.0.40
codegen_flags: <defaults>
</compile_context>

<pallas_src>
import functools

import jax
import jax.numpy as jnp
import numpy as np
from jax import lax
from jax.experimental import pallas as pl
from jax.experimental.pallas import tpu as pltpu


def _sage_sparse_kernel(start_ref, ntiles_ref,           # scalar prefetch (SMEM)
                        dst_ref, featn_ref, self_ref,    # edge-tiled / node-tiled inputs
                        wt_ref, wb_ref, b_ref,           # fused linear parameters
                        out_ref,                         # (TN, O_pad) f32, resident over j
                        acc_ref, *cnt_scratch,           # VMEM scratch
                        count_col):
    i = pl.program_id(0)                  # node tile ("parallel")
    j = pl.program_id(1)                  # edge-tile slot within the node tile ("arbitrary")
    nt = ntiles_ref[i]                    # number of real edge tiles for this node tile

    @pl.when(j == 0)
    def _init():
        acc_ref[...] = jnp.zeros_like(acc_ref)
        if count_col is None:
            cnt_scratch[0][...] = jnp.zeros_like(cnt_scratch[0])
        # Edge-independent half of the fused linear (self features) + bias; overlaps edge DMA.
        out_ref[...] = (jnp.dot(self_ref[...], wt_ref[...],
                                preferred_element_type=jnp.float32) + b_ref[...])

    @pl.when(j < nt)
    def _accumulate():
        tn = acc_ref.shape[0]
        te = dst_ref.shape[1]
        dst = dst_ref[...]                                       # (1, TE) node-tile-local ids
        row = lax.broadcasted_iota(jnp.int32, (tn, te), 0)
        mask = row == dst                                        # (TN, TE) bool
        onehot = mask.astype(jnp.bfloat16)                       # single cast (review item 4)
        # Scatter-sum (and, via the spare padded lane, the edge count) in one MXU matmul.
        acc_ref[...] += jnp.dot(onehot, featn_ref[...],
                                preferred_element_type=jnp.float32)
        if count_col is None:                                    # XLU fallback (D % 128 == 0)
            cnt_scratch[0][...] += jnp.sum(jnp.where(mask, 1.0, 0.0),
                                           axis=1, keepdims=True)

    @pl.when(j == pl.num_programs(1) - 1)
    def _finalize():
        acc = acc_ref[...]
        if count_col is None:
            cnt = cnt_scratch[0][...]
        else:
            cnt = acc[:, count_col:count_col + 1]                # count rode in spare lane D
        inv = pl.reciprocal(jnp.maximum(cnt, 1.0), approx=True)  # scatter-mean divide (EUP)
        mean = (acc * inv).astype(jnp.bfloat16)
        out_ref[...] += jnp.dot(mean, wb_ref[...], preferred_element_type=jnp.float32)


def _round_up(x, m):
    return (x + m - 1) // m * m


def sage_sparse_layer(feature, relation_indices, relation_weight, weight, bias,
                      *, node_tile=256, edge_tile=512):
    """feature: (N, D) f32; relation_indices: (2, E) int (row0=dst/segment, row1=src/neighbor);
    relation_weight: (E, 1) or (E,) f32; weight: (O, 2D) f32 (torch Linear layout); bias: (O,)."""
    n, d = feature.shape
    o = weight.shape[0]
    e = relation_indices.shape[1]
    assert weight.shape[1] == 2 * d

    d_pad = _round_up(d, 128)
    o_pad = _round_up(o, 128)
    tn = _round_up(max(8, min(node_tile, _round_up(n, 8))), 8)
    te = _round_up(max(128, min(edge_tile, _round_up(max(e, 1), 128))), 128)
    n_pad = _round_up(n, tn)
    n_tiles = n_pad // tn
    count_col = d if d < d_pad else None   # spare padded lane carries the per-dst edge count

    # ---- host-side CSR layout: sort edges by destination node tile; pad each node tile's
    #      edge range to a whole number of te-sized edge tiles (>=1 so every tile is valid).
    dst_np = np.asarray(jax.device_get(relation_indices[0])).astype(np.int32).reshape(-1)
    src_np = np.asarray(jax.device_get(relation_indices[1])).astype(np.int32).reshape(-1)
    rw_np = np.asarray(jax.device_get(relation_weight)).astype(np.float32).reshape(-1)

    order = np.argsort(dst_np, kind="stable")
    dst_s, src_s, rw_s = dst_np[order], src_np[order], rw_np[order]
    tile_of_edge = (dst_s // tn).astype(np.int64)
    counts = np.bincount(tile_of_edge, minlength=n_tiles).astype(np.int64)
    ntiles = np.maximum((counts + te - 1) // te, 1)
    starts = np.zeros((n_tiles,), np.int64)
    starts[1:] = np.cumsum(ntiles)[:-1]
    max_tiles = int(ntiles.max())
    total_tiles = int(ntiles.sum())
    e_lay = total_tiles * te

    first_edge = np.zeros((n_tiles,), np.int64)
    first_edge[1:] = np.cumsum(counts)[:-1]
    rank = np.arange(e, dtype=np.int64) - first_edge[tile_of_edge]
    slot = starts[tile_of_edge] * te + rank

    dst_lay = np.full((e_lay,), -1, np.int32)                       # -1 never matches a row
    dst_lay[slot] = (dst_s - tile_of_edge * tn).astype(np.int32)    # node-tile-local ids
    src_lay = np.zeros((e_lay,), np.int32)
    src_lay[slot] = src_s
    rw_lay = np.zeros((e_lay,), np.float32)
    rw_lay[slot] = rw_s
    valid_lay = np.zeros((e_lay,), np.float32)
    valid_lay[slot] = 1.0

    # ---- device-side prep: gather feature[src] * rw (torch index_select) via XLA; the kernel
    #      streams the result edge-tile by edge-tile as lane-dense bf16.
    src_dev = jnp.asarray(src_lay)
    rw_dev = jnp.asarray(rw_lay)
    valid_dev = jnp.asarray(valid_lay)
    gathered = jnp.take(feature.astype(jnp.float32), src_dev, axis=0)           # (E_lay, D)
    feat_n = jnp.where(valid_dev[:, None] > 0, gathered * rw_dev[:, None], 0.0)  # NaN-safe pad
    featn_p = jnp.zeros((e_lay, d_pad), jnp.bfloat16).at[:, :d].set(feat_n.astype(jnp.bfloat16))
    if count_col is not None:
        featn_p = featn_p.at[:, count_col].set(valid_dev.astype(jnp.bfloat16))

    dst_dev = jnp.asarray(dst_lay).reshape(1, e_lay)
    feat_self = jnp.zeros((n_pad, d_pad), jnp.bfloat16).at[:n, :d].set(
        feature.astype(jnp.bfloat16))

    # Fused linear split into self / mean halves (torch Linear weight is (O, 2D)).
    w_top = jnp.zeros((d_pad, o_pad), jnp.bfloat16).at[:d, :o].set(
        jnp.transpose(weight[:, :d]).astype(jnp.bfloat16))
    w_bot = jnp.zeros((d_pad, o_pad), jnp.bfloat16).at[:d, :o].set(
        jnp.transpose(weight[:, d:]).astype(jnp.bfloat16))
    b_p = jnp.zeros((1, o_pad), jnp.float32).at[0, :o].set(bias.astype(jnp.float32))

    tile_start = jnp.asarray(starts.astype(np.int32))   # block index of first edge tile per i
    tile_cnt = jnp.asarray(ntiles.astype(np.int32))     # number of edge tiles per i

    def edge_block(i, j, start_ref, cnt_ref):
        # Clamp idle steps to the last real block -> no index change -> DMA is skipped.
        return start_ref[i] + jnp.minimum(j, cnt_ref[i] - 1)

    # Explicit VMEM budget (double-buffered pipeline blocks + scratch), capped for v7x (64 MiB).
    est = (2 * te * d_pad * 2 + 2 * 8 * te * 4 + 2 * tn * d_pad * 2 +
           2 * 2 * d_pad * o_pad * 2 + 2 * 8 * o_pad * 4 + 2 * tn * o_pad * 4 +
           tn * d_pad * 4 + tn * 128 * 4)
    vmem_limit = int(min(48 * 2**20, max(2 * est, 16 * 2**20)))

    scratch = [pltpu.VMEM((tn, d_pad), jnp.float32)]          # segment-sum accumulator
    if count_col is None:
        scratch.append(pltpu.VMEM((tn, 1), jnp.float32))      # XLU edge-count fallback

    out_p = pl.pallas_call(
        functools.partial(_sage_sparse_kernel, count_col=count_col),
        out_shape=jax.ShapeDtypeStruct((n_pad, o_pad), jnp.float32),
        grid_spec=pltpu.PrefetchScalarGridSpec(
            num_scalar_prefetch=2,
            grid=(n_tiles, max_tiles),
            in_specs=[
                pl.BlockSpec((1, te), lambda i, j, s, c: (0, edge_block(i, j, s, c))),       # dst
                pl.BlockSpec((te, d_pad), lambda i, j, s, c: (edge_block(i, j, s, c), 0)),   # feat_n
                pl.BlockSpec((tn, d_pad), lambda i, j, s, c: (i, 0)),                        # self
                pl.BlockSpec((d_pad, o_pad), lambda i, j, s, c: (0, 0)),                     # W_top
                pl.BlockSpec((d_pad, o_pad), lambda i, j, s, c: (0, 0)),                     # W_bot
                pl.BlockSpec((1, o_pad), lambda i, j, s, c: (0, 0)),                         # bias
            ],
            out_specs=pl.BlockSpec((tn, o_pad), lambda i, j, s, c: (i, 0)),
            scratch_shapes=scratch),
        compiler_params=pltpu.CompilerParams(
            dimension_semantics=("parallel", "arbitrary"),
            vmem_limit_bytes=vmem_limit),
    )(tile_start, tile_cnt, dst_dev, featn_p, feat_self, w_top, w_bot, b_p)

    return out_p[:n, :o]


def _reference(feature, relation_indices, relation_weight, weight, bias):
    n, d = feature.shape
    dst = relation_indices[0]
    src = relation_indices[1]
    feat_n = feature[src] * relation_weight.reshape(-1, 1)
    seg = jnp.zeros((n, d), jnp.float32).at[dst].add(feat_n)
    cnt = jnp.zeros((n, 1), jnp.float32).at[dst].add(1.0)
    mean = seg / jnp.maximum(cnt, 1.0)
    concat = jnp.concatenate([feature, mean], axis=1)
    return concat @ weight.T + bias[None, :]


if __name__ == "__main__":
    # Small deterministic problem exercising multiple node tiles, multiple edge tiles per node
    # tile, ragged tails and padding: N=50, E=600, tiles 16 x 128 -> grid (4, 2).
    input_dim, output_dim = 16, 24
    n_nodes, n_edges = 50, 600

    key = jax.random.PRNGKey(0)
    k1, k2, k3, k4, k5, k6 = jax.random.split(key, 6)

    feature = jax.random.normal(k1, (n_nodes, input_dim), jnp.float32)
    relation_indices = jnp.stack([
        jax.random.randint(k2, (n_edges,), 0, n_nodes),   # dst (segment) indices
        jax.random.randint(k3, (n_edges,), 0, n_nodes),   # src (neighbor) indices
    ]).astype(jnp.int32)
    relation_weight = jax.random.uniform(k4, (n_edges, 1), jnp.float32, 0.5, 1.5)

    # nn.Linear(2*input_dim, output_dim, bias=True), deterministic synthetic init.
    bound = 1.0 / (2 * input_dim) ** 0.5
    weight = jax.random.uniform(k5, (output_dim, 2 * input_dim), jnp.float32, -bound, bound)
    bias = jax.random.uniform(k6, (output_dim,), jnp.float32, -bound, bound)

    out = sage_sparse_layer(feature, relation_indices, relation_weight, weight, bias,
                            node_tile=16, edge_tile=128)
    out = jax.block_until_ready(out)

    ref = _reference(feature, relation_indices, relation_weight, weight, bias)
    assert out.shape == (n_nodes, output_dim)
    assert jnp.allclose(out, ref, rtol=2e-2, atol=2e-2), "mismatch vs reference"

    print("KERNEL_OK")
</pallas_src>

<mosaic_0001>
module attributes {stable_mosaic.version = 11 : i64} {
  func.func @_sage_sparse_kernel(%arg0: i32, %arg1: i32, %arg2: memref<4xi32, #tpu.memory_space<smem>>, %arg3: memref<4xi32, #tpu.memory_space<smem>>, %arg4: memref<1x128xi32, #tpu.memory_space<vmem>>, %arg5: memref<128x128xbf16, #tpu.memory_space<vmem>>, %arg6: memref<16x128xbf16, #tpu.memory_space<vmem>>, %arg7: memref<128x128xbf16, #tpu.memory_space<vmem>>, %arg8: memref<128x128xbf16, #tpu.memory_space<vmem>>, %arg9: memref<1x128xf32, #tpu.memory_space<vmem>>, %arg10: memref<16x128xf32, #tpu.memory_space<vmem>>, %arg11: memref<16x128xf32, #tpu.memory_space<vmem>>) attributes {dimension_semantics = [#tpu.dimension_semantics<parallel>, #tpu.dimension_semantics<arbitrary>], iteration_bounds = array<i64: 4, 2>, scalar_prefetch = 2 : i64, scratch_operands = 1 : i64, tpu.core_type = #tpu.core_type<tc>, window_params = [{transform_indices = @transform_0, window_bounds = array<i64: 1, 128>}, {transform_indices = @transform_1, window_bounds = array<i64: 128, 128>}, {transform_indices = @transform_2, window_bounds = array<i64: 16, 128>}, {pipeline_mode = #tpu.pipeline_mode<synchronous>, transform_indices = @transform_3, window_bounds = array<i64: 128, 128>}, {pipeline_mode = #tpu.pipeline_mode<synchronous>, transform_indices = @transform_4, window_bounds = array<i64: 128, 128>}, {pipeline_mode = #tpu.pipeline_mode<synchronous>, transform_indices = @transform_5, window_bounds = array<i64: 1, 128>}, {transform_indices = @transform_6, window_bounds = array<i64: 16, 128>}]} {
    %0 = arith.index_cast %arg0 : i32 to index
    %1 = memref.load %arg3[%0] : memref<4xi32, #tpu.memory_space<smem>>
    %c0_i32 = arith.constant 0 : i32
    %2 = arith.cmpi eq, %arg1, %c0_i32 : i32
    %3 = arith.extui %2 : i1 to i32
    %c0_i32_0 = arith.constant 0 : i32
    %4 = arith.cmpi ne, %3, %c0_i32_0 : i32
    scf.if %4 {
      %cst = arith.constant 0.000000e+00 : f32
      %11 = vector.broadcast %cst : f32 to vector<16x128xf32>
      %c0 = arith.constant 0 : index
      %c0_3 = arith.constant 0 : index
      %12 = vector.load %arg11[%c0, %c0_3] : memref<16x128xf32, #tpu.memory_space<vmem>>, vector<16x128xf32>
      tpu.vector_store %arg11[%c0, %c0_3], %11 {strides = array<i32>} : memref<16x128xf32, #tpu.memory_space<vmem>>, vector<16x128xf32>,
      %c0_4 = arith.constant 0 : index
      %c0_5 = arith.constant 0 : index
      %13 = vector.load %arg6[%c0_4, %c0_5] : memref<16x128xbf16, #tpu.memory_space<vmem>>, vector<16x128xbf16>
      %c0_6 = arith.constant 0 : index
      %c0_7 = arith.constant 0 : index
      %14 = vector.load %arg7[%c0_6, %c0_7] : memref<128x128xbf16, #tpu.memory_space<vmem>>, vector<128x128xbf16>
      %cst_8 = arith.constant dense<0.000000e+00> : vector<16x128xf32>
      %15 = tpu.matmul %13, %14, %cst_8 {dimension_numbers = #tpu.dot_dimension_numbers<[1], [0], [0], [1], [0, 0, 1, 1], [], []>} : vector<16x128xbf16>, vector<128x128xbf16>, vector<16x128xf32> -> vector<16x128xf32>
      %c0_9 = arith.constant 0 : index
      %c0_10 = arith.constant 0 : index
      %16 = vector.load %arg9[%c0_9, %c0_10] : memref<1x128xf32, #tpu.memory_space<vmem>>, vector<1x128xf32>
      %17 = vector.broadcast %16 : vector<1x128xf32> to vector<16x128xf32>
      %18 = arith.addf %15, %17 : vector<16x128xf32>
      %c0_11 = arith.constant 0 : index
      %c0_12 = arith.constant 0 : index
      %19 = vector.load %arg10[%c0_11, %c0_12] : memref<16x128xf32, #tpu.memory_space<vmem>>, vector<16x128xf32>
      tpu.vector_store %arg10[%c0_11, %c0_12], %18 {strides = array<i32>} : memref<16x128xf32, #tpu.memory_space<vmem>>, vector<16x128xf32>,
    } else {
    }
    %5 = arith.cmpi slt, %arg1, %1 : i32
    %6 = arith.extui %5 : i1 to i32
    %c0_i32_1 = arith.constant 0 : i32
    %7 = arith.cmpi ne, %6, %c0_i32_1 : i32
    scf.if %7 {
      %c0 = arith.constant 0 : index
      %c0_3 = arith.constant 0 : index
      %11 = vector.load %arg4[%c0, %c0_3] : memref<1x128xi32, #tpu.memory_space<vmem>>, vector<1x128xi32>
      %12 = tpu.iota {dimensions = array<i32: 0>} : vector<16x128xi32>
      %13 = vector.broadcast %11 : vector<1x128xi32> to vector<16x128xi32>
      %14 = arith.cmpi eq, %12, %13 : vector<16x128xi32>
      %15 = arith.extui %14 : vector<16x128xi1> to vector<16x128xi32>
      %16 = arith.sitofp %15 : vector<16x128xi32> to vector<16x128xf32>
      %17 = arith.truncf %16 : vector<16x128xf32> to vector<16x128xbf16>
      %c0_4 = arith.constant 0 : index
      %c0_5 = arith.constant 0 : index
      %18 = vector.load %arg11[%c0_4, %c0_5] : memref<16x128xf32, #tpu.memory_space<vmem>>, vector<16x128xf32>
      %c0_6 = arith.constant 0 : index
      %c0_7 = arith.constant 0 : index
      %19 = vector.load %arg5[%c0_6, %c0_7] : memref<128x128xbf16, #tpu.memory_space<vmem>>, vector<128x128xbf16>
      %cst = arith.constant dense<0.000000e+00> : vector<16x128xf32>
      %20 = tpu.matmul %17, %19, %cst {dimension_numbers = #tpu.dot_dimension_numbers<[1], [0], [0], [1], [0, 0, 1, 1], [], []>} : vector<16x128xbf16>, vector<128x128xbf16>, vector<16x128xf32> -> vector<16x128xf32>
      %21 = arith.addf %18, %20 : vector<16x128xf32>
      %c0_8 = arith.constant 0 : index
      %c0_9 = arith.constant 0 : index
      %22 = vector.load %arg11[%c0_8, %c0_9] : memref<16x128xf32, #tpu.memory_space<vmem>>, vector<16x128xf32>
      tpu.vector_store %arg11[%c0_8, %c0_9], %21 {strides = array<i32>} : memref<16x128xf32, #tpu.memory_space<vmem>>, vector<16x128xf32>,
    } else {
    }
    %c1_i32 = arith.constant 1 : i32
    %8 = arith.cmpi eq, %arg1, %c1_i32 : i32
    %9 = arith.extui %8 : i1 to i32
    %c0_i32_2 = arith.constant 0 : i32
    %10 = arith.cmpi ne, %9, %c0_i32_2 : i32
    scf.if %10 {
      %c0 = arith.constant 0 : index
      %c0_3 = arith.constant 0 : index
      %11 = vector.load %arg11[%c0, %c0_3] : memref<16x128xf32, #tpu.memory_space<vmem>>, vector<16x128xf32>
      %12 = vector.extract_strided_slice %11 {offsets = [0, 16], sizes = [16, 1], strides = [1, 1]} : vector<16x128xf32> to vector<16x1xf32>
      %cst = arith.constant 1.000000e+00 : f32
      %13 = vector.broadcast %cst : f32 to vector<16x1xf32>
      %14 = arith.maximumf %12, %13 : vector<16x1xf32>
      %15 = tpu.reciprocal %14 {approx = true} : vector<16x1xf32> -> vector<16x1xf32>
      %16 = vector.broadcast %15 : vector<16x1xf32> to vector<16x128xf32>
      %17 = arith.mulf %11, %16 : vector<16x128xf32>
      %18 = arith.truncf %17 : vector<16x128xf32> to vector<16x128xbf16>
      %c0_4 = arith.constant 0 : index
      %c0_5 = arith.constant 0 : index
      %19 = vector.load %arg10[%c0_4, %c0_5] : memref<16x128xf32, #tpu.memory_space<vmem>>, vector<16x128xf32>
      %c0_6 = arith.constant 0 : index
      %c0_7 = arith.constant 0 : index
      %20 = vector.load %arg8[%c0_6, %c0_7] : memref<128x128xbf16, #tpu.memory_space<vmem>>, vector<128x128xbf16>
      %cst_8 = arith.constant dense<0.000000e+00> : vector<16x128xf32>
      %21 = tpu.matmul %18, %20, %cst_8 {dimension_numbers = #tpu.dot_dimension_numbers<[1], [0], [0], [1], [0, 0, 1, 1], [], []>} : vector<16x128xbf16>, vector<128x128xbf16>, vector<16x128xf32> -> vector<16x128xf32>
      %22 = arith.addf %19, %21 : vector<16x128xf32>
      %c0_9 = arith.constant 0 : index
      %c0_10 = arith.constant 0 : index
      %23 = vector.load %arg10[%c0_9, %c0_10] : memref<16x128xf32, #tpu.memory_space<vmem>>, vector<16x128xf32>
      tpu.vector_store %arg10[%c0_9, %c0_10], %22 {strides = array<i32>} : memref<16x128xf32, #tpu.memory_space<vmem>>, vector<16x128xf32>,
    } else {
    }
    return
  }
  func.func @transform_0(%arg0: i32, %arg1: i32, %arg2: memref<4xi32, #tpu.memory_space<smem>>, %arg3: memref<4xi32, #tpu.memory_space<smem>>) -> (i32, i32) {
    %0 = arith.index_cast %arg0 : i32 to index
    %1 = memref.load %arg2[%0] : memref<4xi32, #tpu.memory_space<smem>>
    %2 = arith.index_cast %arg0 : i32 to index
    %3 = memref.load %arg3[%2] : memref<4xi32, #tpu.memory_space<smem>>
    %c1_i32 = arith.constant 1 : i32
    %4 = arith.subi %3, %c1_i32 : i32
    %5 = arith.minsi %arg1, %4 : i32
    %6 = arith.addi %1, %5 : i32
    %c0_i32 = arith.constant 0 : i32
    %c0_i32_0 = arith.constant 0 : i32
    return %c0_i32, %6 : i32, i32
  }
  func.func @transform_1(%arg0: i32, %arg1: i32, %arg2: memref<4xi32, #tpu.memory_space<smem>>, %arg3: memref<4xi32, #tpu.memory_space<smem>>) -> (i32, i32) {
    %0 = arith.index_cast %arg0 : i32 to index
    %1 = memref.load %arg2[%0] : memref<4xi32, #tpu.memory_space<smem>>
    %2 = arith.index_cast %arg0 : i32 to index
    %3 = memref.load %arg3[%2] : memref<4xi32, #tpu.memory_space<smem>>
    %c1_i32 = arith.constant 1 : i32
    %4 = arith.subi %3, %c1_i32 : i32
    %5 = arith.minsi %arg1, %4 : i32
    %6 = arith.addi %1, %5 : i32
    %c0_i32 = arith.constant 0 : i32
    %c0_i32_0 = arith.constant 0 : i32
    return %6, %c0_i32 : i32, i32
  }
  func.func @transform_2(%arg0: i32, %arg1: i32, %arg2: memref<4xi32, #tpu.memory_space<smem>>, %arg3: memref<4xi32, #tpu.memory_space<smem>>) -> (i32, i32) {
    %c0_i32 = arith.constant 0 : i32
    %c0_i32_0 = arith.constant 0 : i32
    return %arg0, %c0_i32 : i32, i32
  }
  func.func @transform_3(%arg0: i32, %arg1: i32, %arg2: memref<4xi32, #tpu.memory_space<smem>>, %arg3: memref<4xi32, #tpu.memory_space<smem>>) -> (i32, i32) {
    %c0_i32 = arith.constant 0 : i32
    %c0_i32_0 = arith.constant 0 : i32
    %c0_i32_1 = arith.constant 0 : i32
    return %c0_i32, %c0_i32_0 : i32, i32
  }
  func.func @transform_4(%arg0: i32, %arg1: i32, %arg2: memref<4xi32, #tpu.memory_space<smem>>, %arg3: memref<4xi32, #tpu.memory_space<smem>>) -> (i32, i32) {
    %c0_i32 = arith.constant 0 : i32
    %c0_i32_0 = arith.constant 0 : i32
    %c0_i32_1 = arith.constant 0 : i32
    return %c0_i32, %c0_i32_0 : i32, i32
  }
  func.func @transform_5(%arg0: i32, %arg1: i32, %arg2: memref<4xi32, #tpu.memory_space<smem>>, %arg3: memref<4xi32, #tpu.memory_space<smem>>) -> (i32, i32) {
    %c0_i32 = arith.constant 0 : i32
    %c0_i32_0 = arith.constant 0 : i32
    %c0_i32_1 = arith.constant 0 : i32
    return %c0_i32, %c0_i32_0 : i32, i32
  }
  func.func @transform_6(%arg0: i32, %arg1: i32, %arg2: memref<4xi32, #tpu.memory_space<smem>>, %arg3: memref<4xi32, #tpu.memory_space<smem>>) -> (i32, i32) {
    %c0_i32 = arith.constant 0 : i32
    %c0_i32_0 = arith.constant 0 : i32
    return %arg0, %c0_i32 : i32, i32
  }
}

</mosaic_0001>

<bundles_post_ra>
// kernel: tpu_custom_call.1
= control target key start
LH: loop header
LB: loop body
LE: loop exit
PB: predicated region body
PF: predicated region fallthrough
CT: control target
= control target key end

     0   :  { %s2129_s0 = inlined_call_operand.hbm [shape: s32[4], index: 0, kind: input, shape index: {}]   ;;  %s2130_s2 = inlined_call_operand.vmem [shape: s32[1,896], index: 2, kind: input, shape index: {}]   ;;  %s2131_s3 = inlined_call_operand.hbm [shape: bf16[896,128], index: 3, kind: input, shape index: {}]   ;;  %s2132_s4 = inlined_call_operand.hbm [shape: bf16[64,128], index: 4, kind: input, shape index: {}]   ;;  %s2133_s5 = inlined_call_operand.hbm [shape: bf16[128,128], index: 5, kind: input, shape index: {}]   ;;  %s2134_s6 = inlined_call_operand.hbm [shape: bf16[128,128], index: 6, kind: input, shape index: {}]   ;;  %s2135_s7 = inlined_call_operand.vmem [shape: f32[1,128], index: 7, kind: input, shape index: {}]   ;;  %s2136_s8 = inlined_call_operand.hbm [shape: f32[64,128], index: 8, kind: output, shape index: {}]   ;;  %s2137_s1 = inlined_call_operand.hbm [shape: s32[4], index: 1, kind: input, shape index: {}]  }
   0x1   :  { %2157 = sst [smem:[#allocation33_spill]] %s2130_s2  ;;  %s1319_s29 = scalar_lea.hbm %s2129_s0, 16 }
   0x2   :  { %2158 = sst [smem:[#allocation34_spill]] %s2133_s5  ;;  %p1320_p0 = scmp.ne.s32.totalorder %s2129_s0, %s1319_s29 }
   0x3   :  { %2159 = sst [smem:[#allocation35_spill]] %s2134_s6  ;;  %p1323_p1 = scmp.lt.u32.totalorder %s1319_s29, %s2129_s0 }
   0x4   :  { %2160 = sst [smem:[#allocation36_spill]] %s2135_s7 }
   0x5   :  { %2161 = sst [smem:[#allocation37_spill]] %s2136_s8  ;;  %p1325_p2 = pnand %p1323_p1, %p1320_p0 }
   0x7   :  { %1328 = shalt.err (!%p1325_p2)  }
   0x8   :  { %s1593_s12 = smov [#allocation4]   ;;  %s1329_s17 = scalar_lea.hbm %s2137_s1, 16 }
   0x9   :  { %14 = dma.hbm_to_smem %s2129_s0, 16, %s1593_s12, [#allocation3] }
   0xa   :  { %p1330_p3 = scmp.ne.s32.totalorder %s2137_s1, %s1329_s17  ;;  %p1333_p4 = scmp.lt.u32.totalorder %s1329_s17, %s2137_s1 }
   0xc   :  { %p1335_p5 = pnand %p1333_p4, %p1330_p3 }
   0xe   :  { %1338 = shalt.err (!%p1335_p5)  }
   0xf   :  { %s1594_s22 = smov [#allocation5]  }
  0x10   :  { %16 = dma.hbm_to_smem %s2137_s1, 16, %s1594_s22, [#allocation3] }
  0x11   :  { %1527 = dma.done.wait [#allocation3], 32 }
  0x12   :  { %1528 = vsyncadd [#allocation3], 4294967264 }
  0x13   :  { %18 = sfence }
  0x14   :  { %19 = vsyncpa [#allocation7], 0 }
  0x15   :  { %21 = vsyncpa [#allocation7 + $0x1], 0 }
  0x16   :  { %22 = vsyncpa [#allocation10], 0 }
  0x17   :  { %24 = vsyncpa [#allocation10 + $0x1], 0 }
  0x18   :  { %25 = vsyncpa [#allocation13], 0 }
  0x19   :  { %26 = vsyncpa [#allocation8], 0 }
  0x1a   :  { %28 = vsyncpa [#allocation8 + $0x1], 0  ;;  %s1681_s0 = smov 0   ;;  %s1683_s25 = smov 0  }
  0x1b   :  { %s1685_s26 = smov 0   ;;  %s1687_s27 = smov 0  }
  0x1c   :  { %s1689_s28 = smov 0   ;;  %s1691_s1 = smov 0  }
  0x1d   :  { %s1693_s29 = smov 0   ;;  %s1695_s30 = smov 0  }
  0x1e   :  { %s1697_s9 = smov 0   ;;  %s1699_s10 = smov 0  }
  0x1f   :  { %s1701_s11 = smov 0  }
  0x20 LB: > { %2162 = sst [smem:[#allocation25_spill]] %s1551_s0  ;;  %s1735_s12 = sadd.s32 4294967295, %s1591_s11   ;;  %s1591_s11 = sphi %s1701_s11, %s34_s11   ;;  %s1587_s10 = sphi %s1699_s10, %s2218_s10   ;;  %s1583_s9 = sphi %s1697_s9, %s2217_s9   ;;  %s1579_s30 = sphi %s1695_s30, %s2216_s30   ;;  %s1575_s29 = sphi %s1693_s29, %s2215_s29   ;;  %s1571_s1 = sphi %s1691_s1, %s2214_s1   ;;  %s1567_s28 = sphi %s1689_s28, %s2213_s28   ;;  %s1563_s27 = sphi %s1687_s27, %s2212_s27   ;;  %s1559_s26 = sphi %s1685_s26, %s2211_s26   ;;  %s1555_s25 = sphi %s1683_s25, %s2210_s25   ;;  %s1551_s0 = sphi %s1681_s0, %s2209_s0  }
  0x21   : > { %2163 = sst [smem:[#allocation26_spill]] %s1575_s29  ;;  %s987_s13 = sadd.s32 4294967294, %s1591_s11  }
  0x22   : > { %2164 = sst [smem:[#allocation27_spill]] %s1579_s30  ;;  %p116_p6 = scmp.ne.s32.totalorder %s1567_s28, %s1563_s27 }
  0x23   : > { %p2140_p7 = scmp.eq.s32.totalorder %s1735_s12, 0  ;;  %p142_p8 = scmp.ne.s32.totalorder %s1555_s25, %s1551_s0 }
  0x24   : > { %p235_p10 = scmp.eq.s32.totalorder %s987_s13, 7  ;;  %p992_p12 = scmp.ge.s32.totalorder %s1591_s11, 1 }
  0x25   : > { %p1744_p9 = por %p2140_p7, %p116_p6  ;;  %p1750_p11 = por %p142_p8, %p2140_p7 }
  0x26   : > { %p1755_p13 = por %p235_p10, %p142_p8  ;;  %p242_p0 = scmp.lt.s32.totalorder %s1591_s11, 9 }
  0x27   : > { %s2165_s14 = scalar_select %p1744_p9, 1, 0 }
  0x28   : > { %s2166_s15 = scalar_select %p1750_p11, 1, 0 }
  0x29   : > { %s2168_s16 = scalar_select %p1755_p13, 1, 0 }
  0x2a   : > { %2167 = sst [smem:[#allocation28_spill]] %s2166_s15  ;;  %p1760_p1 = pnand %p992_p12, %p242_p0 }
  0x2b   : > { %2169 = sst [smem:[#allocation29_spill]] %s2168_s16  ;;  %s1595_s18 = smov [#allocation11]  }
  0x2c   : > { %s2170_s17 = scalar_select %p1760_p1, 1, 0 }
  0x2d   : > { %s254_s19 = sshll.u32 %s1595_s18, 4  ;;  %p1157_p2 = pneg %p1760_p1  ;;  %s255_s19 = int_to_ptr.vmem [resolvable:$true] %s254_s19 }
  0x2e   : > { %s1596_s21 = smov [#allocation12]   ;;  %s2172_s5 = sld [smem:[#allocation34_spill]] }
  0x2f   : > { %p1768_p3 = pnand %p1157_p2, %p2140_p7  ;;  %s267_s22 = sshll.u32 %s1596_s21, 4  ;;  %s1772_s22 = int_to_ptr.vmem [resolvable:$true] %s267_s22 }
  0x31   : > { %p1341_p5 = pneg %p1768_p3 }
  0x34   : > { %s1339_s27 = scalar_lea.hbm %s2172_s5, 1024 }
  0x35   : > { %p1340_p4 = scmp.ne.s32.totalorder %s2172_s5, %s1339_s27  ;;  %p1346_p10 = scmp.lt.u32.totalorder %s1339_s27, %s2172_s5 }
  0x37   : > { %p1342_p6 = pnand %p1341_p5, %p1340_p4 }
  0x39   : > { %p1343_p8 = pneg %p1342_p6 }
  0x3b   : > { %p1348_p12 = pnand %p1346_p10, %p1343_p8 }
  0x3d   : > { %1351 = shalt.err (!%p1348_p12)
}
  0x3e   : > { %s1352_s21 = scalar_lea.vmem %s255_s19, 1024  ;;  %p1360_p13 = scmp.lt.s32.totalorder %s255_s19, %s255_s19 }
  0x3f   : > { %p1353_p0 = scmp.ne.s32.totalorder %s255_s19, %s1352_s21  ;;  %p1361_p11 = scmp.lt.s32.totalorder %s1352_s21, %s1352_s21 }
  0x41   : > { %p1355_p2 = pnand %p1353_p0, %p1341_p5  ;;  %p1362_p9 = por %p1361_p11, %p1360_p13 }
  0x43   : > { %p1356_p7 = pneg %p1355_p2 }
  0x45   : > { %p1363_p1 = pnand %p1362_p9, %p1356_p7 }
  0x47   : > { %1366 = shalt.err (!%p1363_p1)
}
  0x48   : > { %s2145_s23 = smov 64   ;;  %s2147_s24 = smov 4  }
  0x49   : > { %1160 = dma.hbm_to_vmem [thread:$0]  (!%p1768_p3), %s2172_s5, 1024, %s255_s19, [#allocation10], %s2145_s23, %s2145_s23, %s2147_s24  }
  0x4a   : > { %s2173_s6 = sld [smem:[#allocation35_spill]] }
  0x50   : > { %s1367_s18 = scalar_lea.hbm %s2173_s6, 1024 }
  0x51   : > { %p1368_p7 = scmp.ne.s32.totalorder %s2173_s6, %s1367_s18  ;;  %p1374_p13 = scmp.lt.u32.totalorder %s1367_s18, %s2173_s6 }
  0x53   : > { %p1370_p9 = pnand %p1368_p7, %p1341_p5 }
  0x55   : > { %p1371_p11 = pneg %p1370_p9 }
  0x57   : > { %p1376_p1 = pnand %p1374_p13, %p1371_p11 }
  0x59   : > { %1379 = shalt.err (!%p1376_p1)
}
  0x5a   : > { %s1380_s19 = scalar_lea.vmem %s1772_s22, 1024  ;;  %p1388_p10 = scmp.lt.s32.totalorder %s1772_s22, %s1772_s22 }
  0x5b   : > { %p1381_p4 = scmp.ne.s32.totalorder %s1772_s22, %s1380_s19  ;;  %p1389_p12 = scmp.lt.s32.totalorder %s1380_s19, %s1380_s19 }
  0x5d   : > { %p1383_p6 = pnand %p1381_p4, %p1341_p5  ;;  %p1390_p0 = por %p1389_p12, %p1388_p10 }
  0x5f   : > { %p1384_p8 = pneg %p1383_p6 }
  0x61   : > { %p1391_p2 = pnand %p1390_p0, %p1384_p8 }
  0x63   : > { %1394 = shalt.err (!%p1391_p2)
}
  0x64   : > { %1163 = dma.hbm_to_vmem [thread:$0]  (!%p1768_p3), %s2173_s6, 1024, %s1772_s22, [#allocation13], %s2145_s23, %s2145_s23, %s2147_s24  }
  0x65   : > { %p229_p5 = scmp.eq.s32.totalorder %s1735_s12, 7  ;;  %s43_s8 = sadd.s32 1, %s1583_s9 }
  0x66   : > { %p44_p7 = scmp.ge.s32.totalorder %s43_s8, 2  ;;  %s46_s20 = sadd.s32 1, %s1587_s10 }
  0x67   : > { %s89_s0 = sld [smem:[#allocation5 + %s1587_s10]]  ;;  %p110_p9 = scmp.ne.s32.totalorder %s1571_s1, %s1567_s28 }
  0x68   : > { %s2220_s8 = smov (%p44_p7, %s43_s8), 0  ;;  %s2222_s20 = smov (!%p44_p7, %s46_s20), %s1587_s10 }
  0x69   : > { %2174 = sst [smem:[#allocation30_spill]] %s2220_s8  ;;  %p48_p11 = scmp.ge.s32.totalorder %s2222_s20, 4 }
  0x6a   : > { %s88_s16 = sld [smem:[#allocation4 + %s1587_s10]]  ;;  %p111_p13 = scmp.eq.s32.totalorder %s1591_s11, 0 }
  0x6b   : > { %s103_s22 = sadd.s32 1, %s1571_s1  ;;  %s2149_s27 = sand.u32 1, %s1571_s1  }
  0x6c   : > { %s2224_s20 = smov (%p48_p11, %s2222_s20), 0  ;;  %p1181_p3 = scmp.lt.s32.totalorder %s1591_s11, 8 }
  0x6d   : > { %2175 = sst [smem:[#allocation31_spill]] %s2224_s20  ;;  %s990_s13 = sadd.s32 4294967295, %s89_s0 }
  0x6e   : > { %p91_p1 = scmp.lt.s32.totalorder %s1583_s9, %s990_s13  ;;  %p1846_p4 = por %p111_p13, %p110_p9 }
  0x6f   : > { %s95_s21 = sld [smem:[#allocation5 + %s2224_s20]]  ;;  %s996_s19 = sshll.u32 %s2149_s27, 6 }
  0x70   : > { %s94_s2 = sld [smem:[#allocation4 + %s2224_s20]]  ;;  %p1859_p6 = pnand %p1181_p3, %p1846_p4 }
  0x71   : > { %s92_s7 = scalar_select %p91_p1, %s1583_s9, %s990_s13 }
  0x72   : > { %s1143_s23 = scalar_select %p1846_p4, [#allocation4], [#allocation15] }
  0x73   : > { %s1144_s24 = scalar_select %p1846_p4, %s1587_s10, 0 }
  0x74   : > { %s93_s5 = sadd.s32 %s92_s7, %s88_s16  ;;  %s2226_s23 = smov (!%p1181_p3, %s1143_s23), [#allocation17] }
  0x75   : > { %s991_s27 = sadd.s32 4294967295, %s95_s21  ;;  %s2228_s24 = smov (!%p1181_p3, %s1144_s24), 0 }
  0x76   : > { %p97_p8 = scmp.lt.s32.totalorder %s2220_s8, %s991_s27  ;;  %s306_s30 = scalar_lea.vmem [#allocation6], %s996_s19 }
  0x77   : > { %s319_s15 = sshll.u32 %s306_s30, 4  ;;  %s129_s7 = sadd.s32 1, %s1559_s26  ;;  %s1884_s15 = int_to_ptr.vmem [resolvable:$true] %s319_s15 }
  0x78   : > { %s98_s13 = scalar_select %p97_p8, %s2220_s8, %s991_s27 }
  0x79   : > { %s1145_s16 = scalar_select %p1846_p4, [#allocation5], [#allocation16] }
  0x7a   : > { %s99_s6 = sadd.s32 %s98_s13, %s94_s2  ;;  %s126_s27 = ssub.s32 %s1587_s10, %s2224_s20 }
  0x7b   : > { %s100_s29 = ssub.s32 %s93_s5, %s99_s6  ;;  %s2230_s16 = smov (!%p1181_p3, %s1145_s16), [#allocation18] }
  0x7c   : > { %p101_p10 = scmp.eq.s32.totalorder %s100_s29, 0  ;;  %s308_s8 = sld [smem:[%s2230_s16 + %s2228_s24]] }
  0x7d   : > { %p127_p12 = scmp.eq.s32.totalorder %s126_s27, 0  ;;  %p136_p0 = scmp.ne.s32.totalorder %s1559_s26, %s1555_s25 }
  0x7e   : > { %s1877_s21 = scalar_select %p101_p10, %s1571_s1, %s103_s22  }
  0x7f   : > { %s1889_s5 = scalar_select %p127_p12, %s1559_s26, %s129_s7  }
  0x80   : > { %2178 = sst [smem:[#allocation32_spill]] %s1877_s21  ;;  %p1893_p2 = por %p229_p5, %p136_p0 }
  0x81   : > { %s307_s6 = sld [smem:[%s2226_s23 + %s2228_s24]]  ;;  %p138_p7 = por %p136_p0, %p111_p13 }
  0x82   : > { %s2179_s29 = scalar_select %p1893_p2, 1, 0 }
  0x83   : > { %s331_s30 = sand.u32 1, %s1559_s26   ;;  %s997_s19 = sadd.s32 4294967295, %s308_s8 }
  0x84   : > { %s1000_s18 = sshll.u32 %s331_s30, 3  ;;  %p310_p9 = scmp.lt.s32.totalorder %s1583_s9, %s997_s19 }
  0x85   : > { %s1050_s2 = sshll.u32 %s1587_s10, 7  ;;  %s333_s13 = scalar_lea.vmem [#allocation9], %s1000_s18 }
  0x86   : > { %s340_s16 = sshll.u32 %s333_s13, 4  ;;  %p1905_p11 = pnand %p1181_p3, %p138_p7  ;;  %s1915_s16 = int_to_ptr.vmem [resolvable:$true] %s340_s16 }
  0x87   : > { %s311_s24 = scalar_select %p310_p9, %s1583_s9, %s997_s19 }
  0x88   : > { %s1913_s21 = scalar_lea.hbm %s2132_s4, %s1050_s2  ;;  %s2181_s13 = sand.u32 1, %s1571_s1  }
  0x89   : > { %s312_s27 = sadd.s32 %s311_s24, %s307_s6  ;;  %s1924_s19 = scalar_lea.sflag [#allocation7], %s2181_s13 }
  0x8a   : > { %s1049_s30 = sshll.u32 %s312_s27, 10  ;;  %p1397_p13 = pneg %p1859_p6 }
  0x8b   : > { %s1920_s18 = scalar_lea.hbm %s2131_s3, %s1049_s30  ;;  %s1400_s22 = scalar_lea.hbm %s2131_s3, 7168 }
  0x8c   : > { %s1395_s6 = scalar_lea.hbm %s1920_s18, 1024  ;;  %p1401_p4 = scmp.lt.u32.totalorder %s1920_s18, %s2131_s3 }
  0x8d   : > { %p1396_p5 = scmp.ne.s32.totalorder %s1920_s18, %s1395_s6  ;;  %p1402_p8 = scmp.lt.u32.totalorder %s1400_s22, %s1395_s6 }
  0x8e   : > { %p1404_p12 = scmp.lt.u32.totalorder %s1395_s6, %s1920_s18 }
  0x8f   : > { %p1398_p3 = pnand %p1397_p13, %p1396_p5  ;;  %p1403_p10 = por %p1402_p8, %p1401_p4 }
  0x91   : > { %p1399_p1 = pneg %p1398_p3  ;;  %p1405_p0 = por %p1404_p12, %p1403_p10 }
  0x93   : > { %p1406_p7 = pnand %p1405_p0, %p1399_p1 }
  0x95   : > { %1409 = shalt.err (!%p1406_p7)
}
  0x96   : > { %s1410_s7 = scalar_lea.vmem %s1884_s15, 1024  ;;  %s1599_s30 = smov [#allocation6]  }
  0x97   : > { %p1411_p9 = scmp.ne.s32.totalorder %s1884_s15, %s1410_s7  ;;  %s1415_s8 = sshll.u32 %s1599_s30, 4  ;;  %s1416_s8 = int_to_ptr.vmem [resolvable:$false] %s1415_s8 }
  0x98   : > { %s1417_s13 = scalar_lea.vmem %s1416_s8, 2048  ;;  %p1418_p2 = scmp.lt.s32.totalorder %s1884_s15, %s1416_s8 }
  0x99   : > { %p1413_p5 = pnand %p1411_p9, %p1397_p13  ;;  %p1419_p4 = scmp.lt.s32.totalorder %s1417_s13, %s1410_s7 }
  0x9b   : > { %p1414_p3 = pneg %p1413_p5  ;;  %p1420_p8 = por %p1419_p4, %p1418_p2 }
  0x9d   : > { %p1421_p10 = pnand %p1420_p8, %p1414_p3 }
  0x9f   : > { %1424 = shalt.err (!%p1421_p10)
}
  0xa0   : > { %s2182_s6 = smov 4   ;;  %s2183_s20 = smov 64  }
  0xa1   : > { %1171 = dma.hbm_to_vmem [thread:$0]  (!%p1859_p6), %s1920_s18, 1024, %s1884_s15, %s1924_s19, %s2183_s20, %s2183_s20, %s2182_s6  }
  0xa2   : > { %s2184_s2 = sand.u32 1, %s1591_s11   ;;  %s1425_s24 = scalar_lea.hbm %s1913_s21, 128 }
  0xa3   : > { %s1957_s22 = scalar_lea.sflag [#allocation10], %s2184_s2  ;;  %p1426_p2 = scmp.ne.s32.totalorder %s1913_s21, %s1425_s24 }
  0xa4   : > { %p1427_p13 = pneg %p1905_p11  ;;  %s1430_s7 = scalar_lea.hbm %s2132_s4, 512 }
  0xa5   : > { %p1431_p0 = scmp.lt.u32.totalorder %s1913_s21, %s2132_s4  ;;  %p1432_p6 = scmp.lt.u32.totalorder %s1430_s7, %s1425_s24 }
  0xa6   : > { %p1428_p1 = pnand %p1427_p13, %p1426_p2  ;;  %p1434_p9 = scmp.lt.u32.totalorder %s1425_s24, %s1913_s21 }
  0xa7   : > { %p1433_p7 = por %p1432_p6, %p1431_p0 }
  0xa8   : > { %p1429_p12 = pneg %p1428_p1 }
  0xa9   : > { %p1435_p5 = por %p1434_p9, %p1433_p7 }
  0xab   : > { %p1436_p3 = pnand %p1435_p5, %p1429_p12 }
  0xad   : > { %1439 = shalt.err (!%p1436_p3)
}
  0xae   : > { %s1440_s15 = scalar_lea.vmem %s1915_s16, 128  ;;  %s1600_s18 = smov [#allocation9]  }
  0xaf   : > { %p1441_p4 = scmp.ne.s32.totalorder %s1915_s16, %s1440_s15  ;;  %s1445_s19 = sshll.u32 %s1600_s18, 4  ;;  %s1446_s19 = int_to_ptr.vmem [resolvable:$false] %s1445_s19 }
  0xb0   : > { %s1447_s13 = scalar_lea.vmem %s1446_s19, 256  ;;  %p1448_p2 = scmp.lt.s32.totalorder %s1915_s16, %s1446_s19 }
  0xb1   : > { %p1443_p8 = pnand %p1441_p4, %p1427_p13  ;;  %p1449_p1 = scmp.lt.s32.totalorder %s1447_s13, %s1440_s15 }
  0xb3   : > { %p1444_p10 = pneg %p1443_p8  ;;  %p1450_p0 = por %p1449_p1, %p1448_p2 }
  0xb5   : > { %p1451_p6 = pnand %p1450_p0, %p1444_p10 }
  0xb7   : > { %1454 = shalt.err (!%p1451_p6)
}
  0xb8   : > { %1174 = dma.hbm_to_vmem [thread:$0]  (!%p1905_p11), %s1913_s21, 128, %s1915_s16, %s1957_s22, %s2183_s20, %s2183_s20, %s2182_s6  }
  0xb9   : > { %p2185_p13 = scmp.ne.s32.totalorder %s2170_s17, 0 }
  0xba   : > { %s354_s2 = sand.u32 (!%p2185_p13), 1, %s1567_s28   ;;  %p2186_p12 = scmp.ne.s32.totalorder (!%p2185_p13), %s2165_s14, 0 }
  0xbb   : > { %352 = sbr.rel (%p2185_p13) target bundleno = 1126 (0x466), region = 44  ;;  %s1004_s24 = sshll.u32 (!%p2185_p13), %s354_s2, 6 }
  0xbc   : > { %s355_s0 = scalar_lea.sflag (!%p2185_p13), [#allocation7], %s354_s2  ;;  %s1991_s27 = scalar_lea.vmem (!%p2185_p13), [#allocation6], %s1004_s24 }
  0xc2   : > { %1530 = dma.done.wait (%p2186_p12), %s355_s0, 1024  }
  0xc3   : > { %1532 = vsyncadd (%p2186_p12), %s355_s0, 4294966272  ;;  %s2187_s23 = sld [smem:[#allocation28_spill]]  ;;  %s363_s7 = sand.u32 1, %s1735_s12  }
  0xc4   : > { %s1999_s21 = sand.u32 1, %s1555_s25   ;;  %s364_s16 = scalar_lea.sflag [#allocation10], %s363_s7 }
  0xc5   : > { %s1005_s17 = sshll.u32 %s1999_s21, 3 }
  0xc6   : > { %s2002_s6 = scalar_lea.vmem [#allocation9], %s1005_s17 }
  0xc9   : > { %p2188_p11 = scmp.ne.s32.totalorder %s2187_s23, 0 }
  0xcb   : > { %1534 = dma.done.wait (%p2188_p11), %s364_s16, 128  }
  0xcc   : > { %1536 = vsyncadd (%p2188_p11), %s364_s16, 4294967168  ;;  %p2189_p7 = scmp.eq.s32.totalorder %s1735_s12, 0 }
  0xce   : > { %1538 = dma.done.wait (%p2189_p7), [#allocation10], 1024   ;;  %p2190_p9 = pmov %p2189_p7 }
  0xcf   : > { %p2191_p5 = pmov %p2189_p7 }
  0xd0   : > { %1540 = vsyncadd (%p2190_p9), [#allocation10], 4294966272 }
  0xd1   : > { %1542 = dma.done.wait (%p2191_p5), [#allocation13], 1024   ;;  %p2192_p3 = pmov %p2191_p5 }
  0xd2   : > { %s2193_s14 = sld [smem:[#allocation27_spill]]  ;;  %s2194_s20 = sld [smem:[#allocation26_spill]] }
  0xd3   : > { %1544 = vsyncadd (%p2192_p3), [#allocation13], 4294966272  ;;  %s1008_s22 = sshll.u32 %s1999_s21, 4  ;;  %s2195_s24 = sld [smem:[#allocation33_spill]] }
  0xd4   : > { %s2030_s23 = scalar_lea.vmem [#allocation14], %s1008_s22 }
  0xd8   : > { %s419_s30 = sld [smem:[#allocation5 + %s2193_s14]]  ;;  %p1010_p10 = scmp.ne.s32.totalorder %s2194_s20, 0 }
  0xd9   : > { %s2019_s8 = sld [smem:[#allocation5 + %s2193_s14]]  ;;  %v1289_v0 = vld [vmem:[#allocation11] sm:$0xff] (!%p1010_p10)   ;;  %v1601_v1 = vmov (!%p1010_p10), 0.0   ;;  %v1290_v2 = vld [vmem:[#allocation11 + $0x8] sm:$0xff] (!%p1010_p10)   ;;  %vm1602_vm0 = vmmov (!%p1010_p10), 0   ;;  %v1291_v3 = vld [vmem:[#allocation11 + $0x10] sm:$0xff] (!%p1010_p10)  }
  0xda   : > { %s418_s15 = sld [smem:[#allocation4 + %s2193_s14]]  ;;  %448 = vst [vmem:[#allocation2] sm:$0xff] (!%p1010_p10), %v1601_v1  ;;  %449 = vst [vmem:[#allocation2 + $0x8] sm:$0xff] (!%p1010_p10), %v1601_v1  ;;  %1079 = vmatprep.subr.bf16.mxu0 (!%p1010_p10), %v1601_v1  ;;  %1095 = vmatprep.mubr.msk.bf16.mxu0 (!%p1010_p10), %vm1602_vm0, %v1601_v1  ;;  %v1292_v4 = vld [vmem:[#allocation11 + $0x18] sm:$0xff] (!%p1010_p10)   ;;  %v1293_v5 = vld [vmem:[#allocation11 + $0x20] sm:$0xff] (!%p1010_p10)  }
  0xdb   : > { %1080 = vmatpush3.bf16.msra.mxu0 (!%p1010_p10), %v1289_v0  ;;  %v1294_v6 = vld [vmem:[#allocation11 + $0x28] sm:$0xff] (!%p1010_p10)   ;;  %v1295_v7 = vld [vmem:[#allocation11 + $0x30] sm:$0xff] (!%p1010_p10)   ;;  %v1296_v8 = vld [vmem:[#allocation11 + $0x38] sm:$0xff] (!%p1010_p10)   ;;  %s2196_s16 = sld [smem:[#allocation36_spill]] (!%p1010_p10) }
  0xdc   : > { %1081 = vmatprep.subr.bf16.mxu0 (!%p1010_p10), %v1601_v1  ;;  %v1297_v9 = vld [vmem:[%s2002_s6] sm:$0xff] (!%p1010_p10)  }
  0xde   : > { %s1009_s18 = sadd.s32 4294967295, %s419_s30 }
  0xdf   : > { %p421_p4 = scmp.lt.s32.totalorder %s2194_s20, %s1009_s18  ;;  %1082 = vmatpush3.bf16.msra.mxu0 (!%p1010_p10), %v1290_v2 }
  0xe0   : > { %1083 = vmatprep.subr.bf16.mxu0 (!%p1010_p10), %v1601_v1 }
  0xe1   : > { %s422_s19 = scalar_select %p421_p4, %s2194_s20, %s1009_s18 }
  0xe2   : > { %447 = sbr.rel (%p1010_p10) target bundleno = 467 (0x1d3), region = 64  ;;  %v1011_v10 = vld [vmem:[%s2196_s16] ss:$0 sm:$0xff] (!%p1010_p10) }
  0xe3   : > { %s423_s13 = sadd.s32 %s422_s19, %s418_s15  ;;  %1084 = vmatpush3.bf16.msra.mxu0 (!%p1010_p10), %v1291_v3 }
  0xe4   : > { %p424_p8 = scmp.lt.s32.totalorder %s423_s13, 6  ;;  %1085 = vmatprep.subr.bf16.mxu0 (!%p1010_p10), %v1601_v1 }
  0xe6   : > { %s2232_s13 = smov (!%p424_p8, %s423_s13), 6 }
  0xe7   : > { %s426_s0 = scalar_lea.vmem %s2195_s24, %s2232_s13  ;;  %1086 = vmatpush3.bf16.msra.mxu0 (!%p1010_p10), %v1292_v4 }
  0xe8   : > { %1087 = vmatprep.subr.bf16.mxu0 (!%p1010_p10), %v1601_v1 }
  0xeb   : > { %1088 = vmatpush3.bf16.msra.mxu0 %v1293_v5 }
  0xec   : > { %1089 = vmatprep.subr.bf16.mxu0 %v1601_v1 }
  0xef   : > { %1090 = vmatpush3.bf16.msra.mxu0 %v1294_v6 }
  0xf0   : > { %1091 = vmatprep.subr.bf16.mxu0 %v1601_v1 }
  0xf3   : > { %1092 = vmatpush3.bf16.msra.mxu0 %v1295_v7 }
  0xf4   : > { %1093 = vmatprep.subr.bf16.mxu0 %v1601_v1 }
  0xf7   : > { %1094 = vmatpush3.bf16.msra.mxu0 %v1296_v8 }
  0xfa   : > { %1096 = vmatmul.mubr.bf16.vlgmr.msra.gmra.mrb[0].mxu0 %v1297_v9 }
 0x1cd   : > { %v563_v11 = vpop.f32.mrb[0].mxu0 }
 0x1ce   : > { %v564_v12 = vadd.f32 %v1011_v10, %v563_v11  ;;  %v1097_v13 = vpop.f32.mrb[1].mxu0 }
 0x1cf   : > { %v566_v14 = vpop.f32.mrb[2].mxu0 }
 0x1d0   : > { %570 = vst [vmem:[%s2030_s23] sm:$0xff] %v564_v12  ;;  %v567_v15 = vadd.f32 %v1011_v10, %v566_v14  ;;  %v1098_v16 = vpop.f32.mrb[3].mxu0 }
 0x1d2   : > { %571 = vst [vmem:[%s2030_s23 + $0x8] sm:$0xff] %v567_v15 }
 0x1d3 PF: > { %s2197_s14 = sld [smem:[#allocation26_spill]] }
 0x1d9   : > { %p1021_p2 = scmp.ge.s32.totalorder %s2197_s14, %s2019_s8 }
 0x1da   : > { %v1298_v17 = vld [vmem:[%s1991_s27] sm:$0xff] (!%p1021_p2)   ;;  %v1603_v18 = vmov (!%p1021_p2), 0.0   ;;  %v1299_v19 = vld [vmem:[%s1991_s27 + $0x8] sm:$0xff] (!%p1021_p2)   ;;  %vm1604_vm1 = vmmov (!%p1021_p2), 0   ;;  %v1300_v20 = vld [vmem:[%s1991_s27 + $0x10] sm:$0xff] (!%p1021_p2)   ;;  %v577_v23 = vlaneseq (!%p1021_p2) }
 0x1db   : > { %575 = sbr.rel (%p1021_p2) target bundleno = 724 (0x2d4), region = 68  ;;  %1099 = vmatprep.subr.bf16.mxu0 (!%p1021_p2), %v1603_v18  ;;  %1115 = vmatprep.mubr.msk.bf16.mxu0 (!%p1021_p2), %vm1604_vm1, %v1603_v18  ;;  %v1301_v21 = vld [vmem:[%s1991_s27 + $0x18] sm:$0xff] (!%p1021_p2)   ;;  %v1302_v22 = vld [vmem:[%s1991_s27 + $0x20] sm:$0xff] (!%p1021_p2)   ;;  %v1303_v24 = vld [vmem:[%s1991_s27 + $0x28] sm:$0xff] (!%p1021_p2)   ;;  %v1605_v30 = vmov (!%p1021_p2), 1.0|1.0  }
 0x1dc   : > { %1100 = vmatpush3.bf16.msra.mxu0 (!%p1021_p2), %v1298_v17  ;;  %v578_v25 = vshrl.u32 (!%p1021_p2), %v577_v23, 7  ;;  %v1304_v26 = vld [vmem:[%s1991_s27 + $0x30] sm:$0xff] (!%p1021_p2)   ;;  %v1022_v28 = vld [vmem:[%s426_s0] ss:$0 sm:$0xff] (!%p1021_p2)  ;;  %v1305_v29 = vld [vmem:[%s1991_s27 + $0x38] sm:$0xff] (!%p1021_p2)  }
 0x1dd   : > { %1101 = vmatprep.subr.bf16.mxu0 (!%p1021_p2), %v1603_v18  ;;  %v591_v31 = vld [vmem:[#allocation2] sm:$0xff] (!%p1021_p2)  ;;  %v592_v33 = vld [vmem:[#allocation2 + $0x8] sm:$0xff] (!%p1021_p2) }
 0x1de   : > { %v579_v27 = vadd.s32 (!%p1021_p2), 8, %v578_v25  ;;  %vm584_vm2 = vcmp.eq.s32.totalorder (!%p1021_p2), %v578_v25, %v1022_v28 }
 0x1e0   : > { %1102 = vmatpush3.bf16.msra.mxu0 (!%p1021_p2), %v1299_v19  ;;  %vm585_vm3 = vcmp.eq.s32.totalorder (!%p1021_p2), %v579_v27, %v1022_v28 }
 0x1e1   : > { %1103 = vmatprep.subr.bf16.mxu0 (!%p1021_p2), %v1603_v18  ;;  %vm1033_vm4 = vmpackc.low (!%p1021_p2), %vm585_vm3, %vm584_vm2 }
 0x1e4   : > { %1104 = vmatpush3.bf16.msra.mxu0 %v1300_v20 }
 0x1e5   : > { %1105 = vmatprep.subr.bf16.mxu0 %v1603_v18 }
 0x1e8   : > { %1106 = vmatpush3.bf16.msra.mxu0 %v1301_v21 }
 0x1e9   : > { %1107 = vmatprep.subr.bf16.mxu0 %v1603_v18 }
 0x1ec   : > { %1108 = vmatpush3.bf16.msra.mxu0 %v1302_v22 }
 0x1ed   : > { %1109 = vmatprep.subr.bf16.mxu0 %v1603_v18 }
 0x1f0   : > { %1110 = vmatpush3.bf16.msra.mxu0 %v1303_v24 }
 0x1f1   : > { %1111 = vmatprep.subr.bf16.mxu0 %v1603_v18 }
 0x1f4   : > { %1112 = vmatpush3.bf16.msra.mxu0 %v1304_v26 }
 0x1f5   : > { %1113 = vmatprep.subr.bf16.mxu0 %v1603_v18 }
 0x1f8   : > { %1114 = vmatpush3.bf16.msra.mxu0 %v1305_v29 }
 0x1fb   : > { %1116 = vmatmul.mubr.msk.bf16.vlgmr.msra.gmra.mrb[0].mxu0 %vm1033_vm4, %v1605_v30 }
 0x2ce   : > { %v691_v32 = vpop.f32.mrb[0].mxu0 }
 0x2cf   : > { %v698_v34 = vadd.f32 %v691_v32, %v591_v31  ;;  %v1117_v35 = vpop.f32.mrb[1].mxu0 }
 0x2d0   : > { %v694_v36 = vpop.f32.mrb[2].mxu0 }
 0x2d1   : > { %700 = vst [vmem:[#allocation2] sm:$0xff] %v698_v34  ;;  %v699_v37 = vadd.f32 %v694_v36, %v592_v33  ;;  %v1118_v38 = vpop.f32.mrb[3].mxu0 }
 0x2d3   : > { %701 = vst [vmem:[#allocation2 + $0x8] sm:$0xff] %v699_v37 }
 0x2d4 PF: > { %s2199_s30 = sld [smem:[#allocation26_spill]] }
 0x2da   : > { %p1035_p1 = scmp.ne.s32.totalorder %s2199_s30, 1 }
 0x2db   : > { %v706_v39 = vld [vmem:[#allocation2] sm:$0xff] (!%p1035_p1)  ;;  %v707_v40 = vld [vmem:[#allocation2 + $0x8] sm:$0xff] (!%p1035_p1)  ;;  %v1606_v41 = vmov (!%p1035_p1), 16   ;;  %v1607_v44 = vmov (!%p1035_p1), 0.0   ;;  %v1309_v47 = vld [vmem:[#allocation12 + $0x10] sm:$0xff] (!%p1035_p1)   ;;  %vm1608_vm5 = vmmov (!%p1035_p1), 0  }
 0x2dc   : > { %705 = sbr.rel (%p1035_p1) target bundleno = 1098 (0x44a), region = 72  ;;  %1306 = vset.pattern.permute.xlu0 (!%p1035_p1), %v1606_v41  ;;  %v708_v42 = vmax.f32 (!%p1035_p1), %v706_v39, 1.0  ;;  %v709_v43 = vmax.f32 (!%p1035_p1), %v707_v40, 1.0  ;;  %1119 = vmatprep.subr.bf16.mxu0 (!%p1035_p1), %v1607_v44  ;;  %v1307_v45 = vld [vmem:[#allocation12] sm:$0xff] (!%p1035_p1)   ;;  %v1308_v46 = vld [vmem:[#allocation12 + $0x8] sm:$0xff] (!%p1035_p1)   ;;  %v1310_v48 = vld [vmem:[#allocation12 + $0x18] sm:$0xff] (!%p1035_p1)  }
 0x2dd   : > { %1120 = vmatpush3.bf16.msra.mxu0 (!%p1035_p1), %v1307_v45  ;;  %v1311_v51 = vld [vmem:[#allocation12 + $0x20] sm:$0xff] (!%p1035_p1)   ;;  %v1312_v52 = vld [vmem:[#allocation12 + $0x28] sm:$0xff] (!%p1035_p1)   ;;  %1135 = vmatprep.mubr.msk.bf16.mxu0 (!%p1035_p1), %vm1608_vm5, %v1607_v44  ;;  %v1313_v53 = vld [vmem:[#allocation12 + $0x30] sm:$0xff] (!%p1035_p1)  }
 0x2de   : > { %1315 = vrcp.f32 (!%p1035_p1), %v708_v42  ;;  %1121 = vmatprep.subr.bf16.mxu0 (!%p1035_p1), %v1607_v44  ;;  %v1314_v54 = vld [vmem:[#allocation12 + $0x38] sm:$0xff] (!%p1035_p1)   ;;  %v725_v60 = vld [vmem:[%s2030_s23] sm:$0xff] (!%p1035_p1) }
 0x2df   : > { %1317 = vrcp.f32 (!%p1035_p1), %v709_v43  ;;  %v726_v62 = vld [vmem:[%s2030_s23 + $0x8] sm:$0xff] (!%p1035_p1) }
 0x2e1   : > { %1122 = vmatpush3.bf16.msra.mxu0 (!%p1035_p1), %v1308_v46 }
 0x2e2   : > { %1123 = vmatprep.subr.bf16.mxu0 (!%p1035_p1), %v1607_v44 }
 0x2e5   : > { %1124 = vmatpush3.bf16.msra.mxu0 %v1309_v47 }
 0x2e6   : > { %1125 = vmatprep.subr.bf16.mxu0 %v1607_v44 }
 0x2e8   : > { %v1316_v49 = vpop.eup %1315 }
 0x2e9   : > { %714 = vperm.xlu0 %1306, %v1316_v49   ;;  %v1318_v50 = vpop.eup %1317  ;;  %1126 = vmatpush3.bf16.msra.mxu0 %v1310_v48 }
 0x2ea   : > { %1127 = vmatprep.subr.bf16.mxu0 %v1607_v44 }
 0x2ed   : > { %719 = vperm.xlu0 %1306, %v1318_v50   ;;  %1128 = vmatpush3.bf16.msra.mxu0 %v1311_v51 }
 0x2ee   : > { %1129 = vmatprep.subr.bf16.mxu0 %v1607_v44 }
 0x2f1   : > { %1130 = vmatpush3.bf16.msra.mxu0 %v1312_v52 }
 0x2f2   : > { %1131 = vmatprep.subr.bf16.mxu0 %v1607_v44 }
 0x2f5   : > { %1132 = vmatpush3.bf16.msra.mxu0 %v1313_v53 }
 0x2f6   : > { %1133 = vmatprep.subr.bf16.mxu0 %v1607_v44 }
 0x2f9   : > { %1134 = vmatpush3.bf16.msra.mxu0 %v1314_v54 }
 0x368   : > { %v715_v55 = vpop.permute.xlu0 %714 }
 0x369   : > { %v722_v57 = vmul.f32 %v715_v55, %v706_v39 }
 0x36c   : > { %v720_v56 = vpop.permute.xlu0 %719 }
 0x36d   : > { %v723_v58 = vmul.f32 %v720_v56, %v707_v40 }
 0x36f   : > { %v724_v59 = vpack.c.bf16 %v723_v58, %v722_v57 }
 0x371   : > { %1136 = vmatmul.mubr.bf16.vlgmr.msra.gmra.mrb[0].mxu0 %v724_v59 }
 0x444   : > { %v825_v61 = vpop.f32.mrb[0].mxu0 }
 0x445   : > { %v832_v63 = vadd.f32 %v825_v61, %v725_v60  ;;  %v1137_v0 = vpop.f32.mrb[1].mxu0 }
 0x446   : > { %v828_v1 = vpop.f32.mrb[2].mxu0 }
 0x447   : > { %834 = vst [vmem:[%s2030_s23] sm:$0xff] %v832_v63  ;;  %v833_v2 = vadd.f32 %v828_v1, %v726_v62  ;;  %v1138_v3 = vpop.f32.mrb[3].mxu0 }
 0x449   : > { %835 = vst [vmem:[%s2030_s23 + $0x8] sm:$0xff] %v833_v2 }
 0x44a PF: > { %s2200_s27 = sld [smem:[#allocation27_spill]]  ;;  %s2201_s19 = sld [smem:[#allocation37_spill]] }
 0x44b   : > { %s850_s12 = sshll.u32 %s2030_s23, 4  ;;  %s837_s2 = scalar_lea.sflag [#allocation8], %s1999_s21  ;;  %s2066_s12 = int_to_ptr.vmem [resolvable:$true] %s850_s12 }
 0x44c   : > { %s1455_s24 = scalar_lea.vmem %s2066_s12, 256  ;;  %p2202_p6 = scmp.ne.s32.totalorder %s2179_s29, 0 }
 0x44d   : > { %p1456_p0 = scmp.ne.s32.totalorder %s2066_s12, %s1455_s24  ;;  %s1609_s0 = smov [#allocation14]  }
 0x44e   : > { %s1459_s7 = sshll.u32 %s1609_s0, 4  ;;  %s1460_s7 = int_to_ptr.vmem [resolvable:$false] %s1459_s7 }
 0x44f   : > { %p1457_p13 = pnand %p1456_p0, %p2202_p6  ;;  %s1461_s17 = scalar_lea.vmem %s1460_s7, 512 }
 0x450   : > { %s1051_s8 = sshll.u32 %s2200_s27, 8  ;;  %p1462_p11 = scmp.lt.s32.totalorder %s2066_s12, %s1460_s7 }
 0x451   : > { %s2063_s13 = scalar_lea.hbm %s2201_s19, %s1051_s8  ;;  %p1458_p12 = pneg %p1457_p13 }
 0x452   : > { %p1463_p7 = scmp.lt.s32.totalorder %s1461_s17, %s1455_s24 }
 0x454   : > { %p1464_p9 = por %p1463_p7, %p1462_p11 }
 0x456   : > { %p1465_p5 = pnand %p1464_p9, %p1458_p12 }
 0x458   : > { %1468 = shalt.err (!%p1465_p5)
}
 0x459   : > { %s1469_s23 = scalar_lea.hbm %s2063_s13, 256  ;;  %s1473_s6 = scalar_lea.hbm %s2201_s19, 1024 }
 0x45a   : > { %p1470_p3 = scmp.ne.s32.totalorder %s2063_s13, %s1469_s23  ;;  %p1474_p10 = scmp.lt.u32.totalorder %s2063_s13, %s2201_s19 }
 0x45b   : > { %p1475_p2 = scmp.lt.u32.totalorder %s1473_s6, %s1469_s23  ;;  %p1477_p0 = scmp.lt.u32.totalorder %s1469_s23, %s2063_s13 }
 0x45c   : > { %p1471_p4 = pnand %p1470_p3, %p2202_p6 }
 0x45d   : > { %p1476_p1 = por %p1475_p2, %p1474_p10 }
 0x45e   : > { %p1472_p8 = pneg %p1471_p4 }
 0x45f   : > { %p1478_p13 = por %p1477_p0, %p1476_p1 }
 0x461   : > { %p1479_p12 = pnand %p1478_p13, %p1472_p8 }
 0x463   : > { %1482 = shalt.err (!%p1479_p12)
}
 0x464   : > { %s1610_s30 = smov 128   ;;  %s1611_s27 = smov 8  }
 0x465   : > { %1155 = dma.vmem_to_hbm [thread:$0]  (%p2202_p6), %s2066_s12, 256, %s2063_s13, %s837_s2, %s1610_s30, %s1610_s30, %s1611_s27  }
 0x466 PF: > { %s2203_s8 = sld [smem:[#allocation25_spill]]  ;;  %s2204_s15 = sld [smem:[#allocation29_spill]] }
 0x467   : > { %p1184_p11 = scmp.ge.s32.totalorder %s1591_s11, 2 }
 0x46c   : > { %s865_s18 = sand.u32 1, %s2203_s8   ;;  %p2205_p7 = scmp.ne.s32.totalorder %s2204_s15, 0 }
 0x46d   : > { %s866_s24 = scalar_lea.sflag [#allocation8], %s865_s18 }
 0x46e   : > { %p1176_p9 = pnand %p1184_p11, %p2205_p7 }
 0x470   : > { %1546 = dma.done.wait (!%p1176_p9), %s866_s24, 256  }
 0x471   : > { %1548 = vsyncadd (!%p1176_p9), %s866_s24, 4294967040  ;;  %s34_s11 = sadd.s32 1, %s1591_s11   ;;  %s2206_s29 = sld [smem:[#allocation32_spill]] }
 0x472   : > { %p31_p5 = scmp.ge.s32.totalorder %s34_s11, 10   ;;  %s2207_s21 = sld [smem:[#allocation30_spill]] }
 0x473   : > { %s2208_s13 = sld [smem:[#allocation31_spill]]  ;;  %s2209_s0 = smov %s1555_s25 }
 0x474   : > { %s2210_s25 = smov %s1559_s26  ;;  %s2211_s26 = smov %s1889_s5 }
 0x475   : > { %s2212_s27 = smov %s1567_s28  ;;  %s2213_s28 = smov %s1571_s1 }
 0x476   : > { %s2216_s30 = smov %s1587_s10  ;;  %33 = sbr.rel (!%p31_p5) target bundleno = 32 (0x20), region = 125 }
 0x477   : > { %s2214_s1 = smov %s2206_s29  ;;  %s2215_s29 = smov %s1583_s9 }
 0x478   : > { %s2217_s9 = smov %s2207_s21 }
 0x479   : > { %s2218_s10 = smov %s2208_s13 }
 0x47d   :  { %871 = vsyncpa [#allocation7], 1 }
 0x47e   :  { %873 = vsyncpa [#allocation7 + $0x1], 1 }
 0x47f   :  { %874 = vsyncpa [#allocation10], 1 }
 0x480   :  { %876 = vsyncpa [#allocation10 + $0x1], 1 }
 0x481   :  { %877 = vsyncpa [#allocation13], 1 }
 0x482   :  { %878 = vsyncpa [#allocation8], 1 }
 0x483   :  { %880 = vsyncpa [#allocation8 + $0x1], 1 }

</bundles_post_ra>
